<compile_context>
chip_gen: v5e
topology: v5e:2x2
jax: 0.10.0
libtpu: 0.0.40
codegen_flags: <defaults>
</compile_context>

<pallas_src>
import functools

import jax
import jax.numpy as jnp
import numpy as np
from jax import lax
from jax.experimental import pallas as pl
from jax.experimental.pallas import tpu as pltpu


_PAD = 8  # row offset of the real data inside the VMEM scratch (tile-aligned)


# -----------------------------------------------------------------------------
# Pallas kernel: fused Conv3d(k=3, stride=(st,1,1), pad=1) + bias + ReLU
# (BN scale already folded into the banded weights by the wrapper.)
# -----------------------------------------------------------------------------
def _conv3d_bn_relu_kernel(x_ref, band_ref, bias_ref, o_ref, xpad_ref, *,
                           stride_t, T, T_out, H):
    # x_ref:    (T, H, W*Cin)          one batch element, W and Cin fused on lanes
    # band_ref: (3, 3, W*Cin, W*Cout)  block-banded weights (W 'same' pad built in)
    # bias_ref: (1, W*Cout)            BN bias, tiled over W
    # o_ref:    (T_out, H, W*Cout)     full output slab for this batch element
    # xpad_ref: (T+2, H+_PAD+1, W*Cin) VMEM scratch: T and H 'same' padding staged here
    WCin = x_ref.shape[-1]
    WCout = o_ref.shape[-1]

    # ---- stage the padded input in VMEM (zero only the halos that get read) ----
    zplane = jnp.zeros((H + _PAD + 1, WCin), xpad_ref.dtype)
    xpad_ref[0] = zplane                                   # temporal front halo
    xpad_ref[T + 1] = zplane                               # temporal back halo
    zrow = jnp.zeros((T + 2, 1, WCin), xpad_ref.dtype)
    xpad_ref[:, pl.ds(_PAD - 1, 1), :] = zrow              # H top halo (all planes)
    xpad_ref[:, pl.ds(_PAD + H, 1), :] = zrow              # H bottom halo
    # real data at temporal offset 1 and tile-aligned row offset _PAD
    xpad_ref[pl.ds(1, T), pl.ds(_PAD, H), :] = x_ref[...]

    bias = bias_ref[...]                                   # (1, W*Cout)

    # ---- 9 banded matmuls over the whole (T_out*H, W*Cout) output slab --------
    # Output (t_out, h) needs input plane t_pad = stride_t*t_out + kt and rows
    # _PAD-1+kh .. _PAD-1+kh+H-1 (W / kw contraction handled by the band).
    acc = jnp.zeros((T_out * H, WCout), jnp.float32)
    for kt in range(3):                                    # static: 9 taps total
        for kh in range(3):
            slab = xpad_ref[pl.ds(kt, T_out, stride=stride_t),
                            pl.ds(_PAD - 1 + kh, H), :]    # (T_out, H, W*Cin)
            acc = acc + jnp.dot(slab.reshape(T_out * H, WCin),
                                band_ref[kt, kh],
                                preferred_element_type=jnp.float32)
    y = jnp.maximum(acc + bias, 0.0)                       # BN bias + ReLU
    o_ref[...] = y.reshape(T_out, H, WCout).astype(o_ref.dtype)


def conv3d_bn_relu_banded(x, band, bias_flat, *, stride_t):
    """x: (N, T, H, W*Cin); band: (3,3,W*Cin,W*Cout); bias_flat: (1, W*Cout)."""
    N, T, H, WCin = x.shape
    WCout = band.shape[-1]
    T_out = (T + 2 - 3) // stride_t + 1

    kernel = functools.partial(_conv3d_bn_relu_kernel,
                               stride_t=stride_t, T=T, T_out=T_out, H=H)

    return pl.pallas_call(
        kernel,
        out_shape=jax.ShapeDtypeStruct((N, T_out, H, WCout), x.dtype),
        grid=(N,),
        in_specs=[
            # whole (unpadded) volume of one batch element, W*C fused on lanes
            pl.BlockSpec((pl.Squeezed(), T, H, WCin), lambda n: (n, 0, 0, 0)),
            # banded weights (grid-invariant -> stays resident in VMEM)
            pl.BlockSpec((3, 3, WCin, WCout), lambda n: (0, 0, 0, 0)),
            # bias (grid-invariant)
            pl.BlockSpec((1, WCout), lambda n: (0, 0)),
        ],
        out_specs=pl.BlockSpec((pl.Squeezed(), T_out, H, WCout),
                               lambda n: (n, 0, 0, 0)),
        scratch_shapes=[pltpu.VMEM((T + 2, H + _PAD + 1, WCin), x.dtype)],
        compiler_params=pltpu.CompilerParams(
            dimension_semantics=("parallel",)),
    )(x, band, bias_flat)


# -----------------------------------------------------------------------------
# Weight preprocessing: BN-scale fold + block-banded weights over W
# -----------------------------------------------------------------------------
def _build_band(w_folded, W):
    """w_folded: (3,3,3,Cin,Cout) -> (3, 3, W*Cin, W*Cout).

    band[kt, kh, w_in*Cin + ci, w_out*Cout + co] =
        w_folded[kt, kh, w_in - w_out + 1, ci, co]  if |w_in - w_out| <= 1 else 0
    so a single matmul over the fused (W*Cin) axis performs the whole kw / Cin
    contraction for one (kt, kh) tap, with W 'same' padding built in.
    """
    kT, kH, kW, Cin, Cout = w_folded.shape
    sel = np.zeros((kW, W, W), dtype=np.float32)
    for kw in range(kW):
        for wo in range(W):
            wi = wo + kw - 1
            if 0 <= wi < W:
                sel[kw, wi, wo] = 1.0
    sel = jnp.asarray(sel, dtype=w_folded.dtype)
    band6 = jnp.einsum("thkco,kij->thicjo", w_folded, sel)   # (3,3,W,Cin,W,Cout)
    return band6.reshape(kT, kH, W * Cin, W * Cout)


# -----------------------------------------------------------------------------
# Module wrapper (parameter setup + NCDHW <-> fused-layout glue)
# -----------------------------------------------------------------------------
class TemporalDownSamplerPallas:
    """Pallas re-implementation of TemporalDownSampler (conv_type='Conv3d').

    Only kernel_sizes=(3,3,3), strides=(2,1,1), paddings=(1,1,1) are supported
    (those are baked into the kernel / band construction).
    """

    def __init__(self, num_levels=4, in_channels=8, out_channels=4,
                 out_indices=(0, 1, 2, 3), key=None, dtype=jnp.float32):
        if key is None:
            key = jax.random.PRNGKey(0)
        self.num_levels = num_levels
        self.out_indices = out_indices
        self.out_channels = out_channels
        self.stride_t = 2
        self.layers = []        # (w_raw, scale, bias) — also used by the reference
        self._band_cache = {}   # (layer_idx, W) -> (band, bias_flat)

        cin = in_channels
        eps = 1e-5
        for i in range(num_levels - 1):
            key, wkey = jax.random.split(key)
            # Conv3d weight (kT, kH, kW, Cin, Cout); bias=False
            w = (jax.random.normal(wkey, (3, 3, 3, cin, out_channels),
                                   dtype=dtype) * 0.05)
            # Deterministic SyncBN parameters (inference mode, running stats).
            idx = jnp.arange(out_channels, dtype=dtype)
            gamma = 1.0 + 0.01 * idx
            beta = 0.01 * idx
            running_mean = 0.02 * idx
            running_var = 1.0 + 0.03 * idx
            scale = gamma / jnp.sqrt(running_var + eps)
            bias = beta - running_mean * scale
            self.layers.append((w, scale, bias))
            cin = out_channels

    def _banded_params(self, i, W):
        key = (i, W)
        if key not in self._band_cache:
            w, scale, bias = self.layers[i]
            # Fold BN scale into the conv weights (exact: conv is linear).
            w_folded = w * scale.reshape(1, 1, 1, 1, -1)
            band = _build_band(w_folded, W)
            bias_flat = jnp.tile(bias, W).reshape(1, W * self.out_channels)
            self._band_cache[key] = (band, bias_flat)
        return self._band_cache[key]

    def __call__(self, x_ncdhw):
        assert x_ncdhw.shape[2] >= 2 ** self.num_levels, (
            f"The temporal length of input {x_ncdhw.shape[2]} is too short for "
            f"{self.num_levels - 1} levels of down-sampling")
        N, C, T, H, W = x_ncdhw.shape

        outs = []
        if 0 in self.out_indices:
            outs.append(x_ncdhw)

        # Single input-side layout op: NCDHW -> (N, T, H, W*C). The layer chain
        # then stays in this fused layout end to end (no per-layer transposes).
        x = jnp.transpose(x_ncdhw, (0, 2, 3, 4, 1)).reshape(N, T, H, W * C)
        for i in range(len(self.layers)):
            band, bias_flat = self._banded_params(i, W)
            x = conv3d_bn_relu_banded(x, band, bias_flat, stride_t=self.stride_t)
            if i + 1 in self.out_indices:
                T_i = x.shape[1]
                outs.append(jnp.transpose(
                    x.reshape(N, T_i, H, W, self.out_channels), (0, 4, 1, 2, 3)))
        return tuple(outs)


# -----------------------------------------------------------------------------
# Pure-JAX reference (validates banding + BN fold + padding handling)
# -----------------------------------------------------------------------------
def _reference_layer(x_ndhwc, w, scale, bias, stride_t):
    y = lax.conv_general_dilated(
        x_ndhwc, w,
        window_strides=(stride_t, 1, 1),
        padding=((1, 1), (1, 1), (1, 1)),
        dimension_numbers=("NDHWC", "DHWIO", "NDHWC"))
    y = y * scale.reshape(1, 1, 1, 1, -1) + bias.reshape(1, 1, 1, 1, -1)
    return jnp.maximum(y, 0.0)


def _reference_forward(model, x_ncdhw):
    outs = []
    if 0 in model.out_indices:
        outs.append(x_ncdhw)
    x = jnp.transpose(x_ncdhw, (0, 2, 3, 4, 1))
    for i, (w, scale, bias) in enumerate(model.layers):
        x = _reference_layer(x, w, scale, bias, model.stride_t)
        if i + 1 in model.out_indices:
            outs.append(jnp.transpose(x, (0, 4, 1, 2, 3)))
    return tuple(outs)


if __name__ == "__main__":
    # Small shapes consistent with the module: (N, C, T, H, W) with T >= 2**4.
    N, C, T, H, W = 2, 8, 16, 8, 8
    key = jax.random.PRNGKey(0)
    kx, kp = jax.random.split(key)
    x = jax.random.normal(kx, (N, C, T, H, W), dtype=jnp.float32)

    model = TemporalDownSamplerPallas(num_levels=4, in_channels=C,
                                      out_channels=4, key=kp)

    outs = jax.block_until_ready(model(x))

    # Validate against the pure-JAX reference.
    refs = jax.block_until_ready(_reference_forward(model, x))
    assert len(outs) == len(refs) == 4
    for o, r in zip(outs, refs):
        assert o.shape == r.shape, (o.shape, r.shape)
        np.testing.assert_allclose(np.asarray(o), np.asarray(r),
                                   rtol=1e-4, atol=1e-4)

    print("KERNEL_OK")
</pallas_src>

<mosaic_0001>
module attributes {stable_mosaic.version = 11 : i64} {
  func.func @_conv3d_bn_relu_kernel(%arg0: i32, %arg1: memref<1x16x8x64xf32, #tpu.memory_space<vmem>>, %arg2: memref<3x3x64x32xf32, #tpu.memory_space<vmem>>, %arg3: memref<1x32xf32, #tpu.memory_space<vmem>>, %arg4: memref<1x8x8x32xf32, #tpu.memory_space<vmem>>, %arg5: memref<18x17x64xf32, #tpu.memory_space<vmem>>) attributes {dimension_semantics = [#tpu.dimension_semantics<parallel>], iteration_bounds = array<i64: 2>, scalar_prefetch = 0 : i64, scratch_operands = 1 : i64, tpu.core_type = #tpu.core_type<tc>, window_params = [{transform_indices = @transform_0, window_bounds = array<i64: 1, 16, 8, 64>}, {pipeline_mode = #tpu.pipeline_mode<synchronous>, transform_indices = @transform_1, window_bounds = array<i64: 3, 3, 64, 32>}, {pipeline_mode = #tpu.pipeline_mode<synchronous>, transform_indices = @transform_2, window_bounds = array<i64: 1, 32>}, {transform_indices = @transform_3, window_bounds = array<i64: 1, 8, 8, 32>}]} {
    %cst = arith.constant 0.000000e+00 : f32
    %0 = vector.broadcast %cst : f32 to vector<17x64xf32>
    %c0 = arith.constant 0 : index
    %c0_0 = arith.constant 0 : index
    %c0_1 = arith.constant 0 : index
    %1 = vector.load %arg5[%c0, %c0_0, %c0_1] : memref<18x17x64xf32, #tpu.memory_space<vmem>>, vector<1x17x64xf32>
    %2 = vector.shape_cast %1 : vector<1x17x64xf32> to vector<17x64xf32>
    %3 = vector.shape_cast %0 : vector<17x64xf32> to vector<1x17x64xf32>
    tpu.vector_store %arg5[%c0, %c0_0, %c0_1], %3 {strides = array<i32>} : memref<18x17x64xf32, #tpu.memory_space<vmem>>, vector<1x17x64xf32>,
    %c17 = arith.constant 17 : index
    %c0_2 = arith.constant 0 : index
    %c0_3 = arith.constant 0 : index
    %4 = vector.load %arg5[%c17, %c0_2, %c0_3] : memref<18x17x64xf32, #tpu.memory_space<vmem>>, vector<1x17x64xf32>
    %5 = vector.shape_cast %4 : vector<1x17x64xf32> to vector<17x64xf32>
    %6 = vector.shape_cast %0 : vector<17x64xf32> to vector<1x17x64xf32>
    tpu.vector_store %arg5[%c17, %c0_2, %c0_3], %6 {strides = array<i32>} : memref<18x17x64xf32, #tpu.memory_space<vmem>>, vector<1x17x64xf32>,
    %cst_4 = arith.constant 0.000000e+00 : f32
    %7 = vector.broadcast %cst_4 : f32 to vector<18x1x64xf32>
    %c0_5 = arith.constant 0 : index
    %c7 = arith.constant 7 : index
    %c0_6 = arith.constant 0 : index
    %8 = vector.load %arg5[%c0_5, %c7, %c0_6] : memref<18x17x64xf32, #tpu.memory_space<vmem>>, vector<18x1x64xf32>
    tpu.vector_store %arg5[%c0_5, %c7, %c0_6], %7 {strides = array<i32>} : memref<18x17x64xf32, #tpu.memory_space<vmem>>, vector<18x1x64xf32>,
    %c0_7 = arith.constant 0 : index
    %c16 = arith.constant 16 : index
    %c0_8 = arith.constant 0 : index
    %9 = vector.load %arg5[%c0_7, %c16, %c0_8] : memref<18x17x64xf32, #tpu.memory_space<vmem>>, vector<18x1x64xf32>
    tpu.vector_store %arg5[%c0_7, %c16, %c0_8], %7 {strides = array<i32>} : memref<18x17x64xf32, #tpu.memory_space<vmem>>, vector<18x1x64xf32>,
    %c0_9 = arith.constant 0 : index
    %c0_10 = arith.constant 0 : index
    %c0_11 = arith.constant 0 : index
    %c0_12 = arith.constant 0 : index
    %10 = vector.load %arg1[%c0_9, %c0_10, %c0_11, %c0_12] : memref<1x16x8x64xf32, #tpu.memory_space<vmem>>, vector<1x16x8x64xf32>
    %11 = vector.shape_cast %10 : vector<1x16x8x64xf32> to vector<16x8x64xf32>
    %c1 = arith.constant 1 : index
    %c8 = arith.constant 8 : index
    %c0_13 = arith.constant 0 : index
    %12 = vector.load %arg5[%c1, %c8, %c0_13] : memref<18x17x64xf32, #tpu.memory_space<vmem>>, vector<16x8x64xf32>
    tpu.vector_store %arg5[%c1, %c8, %c0_13], %11 {strides = array<i32>} : memref<18x17x64xf32, #tpu.memory_space<vmem>>, vector<16x8x64xf32>,
    %c0_14 = arith.constant 0 : index
    %c0_15 = arith.constant 0 : index
    %13 = vector.load %arg3[%c0_14, %c0_15] : memref<1x32xf32, #tpu.memory_space<vmem>>, vector<1x32xf32>
    %cst_16 = arith.constant 0.000000e+00 : f32
    %14 = vector.broadcast %cst_16 : f32 to vector<64x32xf32>
    %c0_17 = arith.constant 0 : index
    %c7_18 = arith.constant 7 : index
    %c0_19 = arith.constant 0 : index
    %15 = tpu.strided_load %arg5[%c0_17, %c7_18, %c0_19] {strides = array<i32: 2, 1, 1>} : memref<18x17x64xf32, #tpu.memory_space<vmem>>, vector<8x8x64xf32>
    %16 = vector.shape_cast %15 : vector<8x8x64xf32> to vector<64x64xf32>
    %c0_20 = arith.constant 0 : index
    %c0_21 = arith.constant 0 : index
    %c0_22 = arith.constant 0 : index
    %c0_23 = arith.constant 0 : index
    %17 = vector.load %arg2[%c0_20, %c0_21, %c0_22, %c0_23] : memref<3x3x64x32xf32, #tpu.memory_space<vmem>>, vector<1x1x64x32xf32>
    %18 = vector.shape_cast %17 : vector<1x1x64x32xf32> to vector<64x32xf32>
    %cst_24 = arith.constant dense<0.000000e+00> : vector<64x32xf32>
    %19 = tpu.matmul %16, %18, %cst_24 {dimension_numbers = #tpu.dot_dimension_numbers<[1], [0], [0], [1], [0, 0, 1, 1], [], []>} : vector<64x64xf32>, vector<64x32xf32>, vector<64x32xf32> -> vector<64x32xf32>
    %20 = arith.addf %14, %19 : vector<64x32xf32>
    %c0_25 = arith.constant 0 : index
    %c8_26 = arith.constant 8 : index
    %c0_27 = arith.constant 0 : index
    %21 = tpu.strided_load %arg5[%c0_25, %c8_26, %c0_27] {strides = array<i32: 2, 1, 1>} : memref<18x17x64xf32, #tpu.memory_space<vmem>>, vector<8x8x64xf32>
    %22 = vector.shape_cast %21 : vector<8x8x64xf32> to vector<64x64xf32>
    %c0_28 = arith.constant 0 : index
    %c1_29 = arith.constant 1 : index
    %c0_30 = arith.constant 0 : index
    %c0_31 = arith.constant 0 : index
    %23 = vector.load %arg2[%c0_28, %c1_29, %c0_30, %c0_31] : memref<3x3x64x32xf32, #tpu.memory_space<vmem>>, vector<1x1x64x32xf32>
    %24 = vector.shape_cast %23 : vector<1x1x64x32xf32> to vector<64x32xf32>
    %cst_32 = arith.constant dense<0.000000e+00> : vector<64x32xf32>
    %25 = tpu.matmul %22, %24, %cst_32 {dimension_numbers = #tpu.dot_dimension_numbers<[1], [0], [0], [1], [0, 0, 1, 1], [], []>} : vector<64x64xf32>, vector<64x32xf32>, vector<64x32xf32> -> vector<64x32xf32>
    %26 = arith.addf %20, %25 : vector<64x32xf32>
    %c0_33 = arith.constant 0 : index
    %c9 = arith.constant 9 : index
    %c0_34 = arith.constant 0 : index
    %27 = tpu.strided_load %arg5[%c0_33, %c9, %c0_34] {strides = array<i32: 2, 1, 1>} : memref<18x17x64xf32, #tpu.memory_space<vmem>>, vector<8x8x64xf32>
    %28 = vector.shape_cast %27 : vector<8x8x64xf32> to vector<64x64xf32>
    %c0_35 = arith.constant 0 : index
    %c2 = arith.constant 2 : index
    %c0_36 = arith.constant 0 : index
    %c0_37 = arith.constant 0 : index
    %29 = vector.load %arg2[%c0_35, %c2, %c0_36, %c0_37] : memref<3x3x64x32xf32, #tpu.memory_space<vmem>>, vector<1x1x64x32xf32>
    %30 = vector.shape_cast %29 : vector<1x1x64x32xf32> to vector<64x32xf32>
    %cst_38 = arith.constant dense<0.000000e+00> : vector<64x32xf32>
    %31 = tpu.matmul %28, %30, %cst_38 {dimension_numbers = #tpu.dot_dimension_numbers<[1], [0], [0], [1], [0, 0, 1, 1], [], []>} : vector<64x64xf32>, vector<64x32xf32>, vector<64x32xf32> -> vector<64x32xf32>
    %32 = arith.addf %26, %31 : vector<64x32xf32>
    %c1_39 = arith.constant 1 : index
    %c7_40 = arith.constant 7 : index
    %c0_41 = arith.constant 0 : index
    %33 = tpu.strided_load %arg5[%c1_39, %c7_40, %c0_41] {strides = array<i32: 2, 1, 1>} : memref<18x17x64xf32, #tpu.memory_space<vmem>>, vector<8x8x64xf32>
    %34 = vector.shape_cast %33 : vector<8x8x64xf32> to vector<64x64xf32>
    %c1_42 = arith.constant 1 : index
    %c0_43 = arith.constant 0 : index
    %c0_44 = arith.constant 0 : index
    %c0_45 = arith.constant 0 : index
    %35 = vector.load %arg2[%c1_42, %c0_43, %c0_44, %c0_45] : memref<3x3x64x32xf32, #tpu.memory_space<vmem>>, vector<1x1x64x32xf32>
    %36 = vector.shape_cast %35 : vector<1x1x64x32xf32> to vector<64x32xf32>
    %cst_46 = arith.constant dense<0.000000e+00> : vector<64x32xf32>
    %37 = tpu.matmul %34, %36, %cst_46 {dimension_numbers = #tpu.dot_dimension_numbers<[1], [0], [0], [1], [0, 0, 1, 1], [], []>} : vector<64x64xf32>, vector<64x32xf32>, vector<64x32xf32> -> vector<64x32xf32>
    %38 = arith.addf %32, %37 : vector<64x32xf32>
    %c1_47 = arith.constant 1 : index
    %c8_48 = arith.constant 8 : index
    %c0_49 = arith.constant 0 : index
    %39 = tpu.strided_load %arg5[%c1_47, %c8_48, %c0_49] {strides = array<i32: 2, 1, 1>} : memref<18x17x64xf32, #tpu.memory_space<vmem>>, vector<8x8x64xf32>
    %40 = vector.shape_cast %39 : vector<8x8x64xf32> to vector<64x64xf32>
    %c1_50 = arith.constant 1 : index
    %c1_51 = arith.constant 1 : index
    %c0_52 = arith.constant 0 : index
    %c0_53 = arith.constant 0 : index
    %41 = vector.load %arg2[%c1_50, %c1_51, %c0_52, %c0_53] : memref<3x3x64x32xf32, #tpu.memory_space<vmem>>, vector<1x1x64x32xf32>
    %42 = vector.shape_cast %41 : vector<1x1x64x32xf32> to vector<64x32xf32>
    %cst_54 = arith.constant dense<0.000000e+00> : vector<64x32xf32>
    %43 = tpu.matmul %40, %42, %cst_54 {dimension_numbers = #tpu.dot_dimension_numbers<[1], [0], [0], [1], [0, 0, 1, 1], [], []>} : vector<64x64xf32>, vector<64x32xf32>, vector<64x32xf32> -> vector<64x32xf32>
    %44 = arith.addf %38, %43 : vector<64x32xf32>
    %c1_55 = arith.constant 1 : index
    %c9_56 = arith.constant 9 : index
    %c0_57 = arith.constant 0 : index
    %45 = tpu.strided_load %arg5[%c1_55, %c9_56, %c0_57] {strides = array<i32: 2, 1, 1>} : memref<18x17x64xf32, #tpu.memory_space<vmem>>, vector<8x8x64xf32>
    %46 = vector.shape_cast %45 : vector<8x8x64xf32> to vector<64x64xf32>
    %c1_58 = arith.constant 1 : index
    %c2_59 = arith.constant 2 : index
    %c0_60 = arith.constant 0 : index
    %c0_61 = arith.constant 0 : index
    %47 = vector.load %arg2[%c1_58, %c2_59, %c0_60, %c0_61] : memref<3x3x64x32xf32, #tpu.memory_space<vmem>>, vector<1x1x64x32xf32>
    %48 = vector.shape_cast %47 : vector<1x1x64x32xf32> to vector<64x32xf32>
    %cst_62 = arith.constant dense<0.000000e+00> : vector<64x32xf32>
    %49 = tpu.matmul %46, %48, %cst_62 {dimension_numbers = #tpu.dot_dimension_numbers<[1], [0], [0], [1], [0, 0, 1, 1], [], []>} : vector<64x64xf32>, vector<64x32xf32>, vector<64x32xf32> -> vector<64x32xf32>
    %50 = arith.addf %44, %49 : vector<64x32xf32>
    %c2_63 = arith.constant 2 : index
    %c7_64 = arith.constant 7 : index
    %c0_65 = arith.constant 0 : index
    %51 = tpu.strided_load %arg5[%c2_63, %c7_64, %c0_65] {strides = array<i32: 2, 1, 1>} : memref<18x17x64xf32, #tpu.memory_space<vmem>>, vector<8x8x64xf32>
    %52 = vector.shape_cast %51 : vector<8x8x64xf32> to vector<64x64xf32>
    %c2_66 = arith.constant 2 : index
    %c0_67 = arith.constant 0 : index
    %c0_68 = arith.constant 0 : index
    %c0_69 = arith.constant 0 : index
    %53 = vector.load %arg2[%c2_66, %c0_67, %c0_68, %c0_69] : memref<3x3x64x32xf32, #tpu.memory_space<vmem>>, vector<1x1x64x32xf32>
    %54 = vector.shape_cast %53 : vector<1x1x64x32xf32> to vector<64x32xf32>
    %cst_70 = arith.constant dense<0.000000e+00> : vector<64x32xf32>
    %55 = tpu.matmul %52, %54, %cst_70 {dimension_numbers = #tpu.dot_dimension_numbers<[1], [0], [0], [1], [0, 0, 1, 1], [], []>} : vector<64x64xf32>, vector<64x32xf32>, vector<64x32xf32> -> vector<64x32xf32>
    %56 = arith.addf %50, %55 : vector<64x32xf32>
    %c2_71 = arith.constant 2 : index
    %c8_72 = arith.constant 8 : index
    %c0_73 = arith.constant 0 : index
    %57 = tpu.strided_load %arg5[%c2_71, %c8_72, %c0_73] {strides = array<i32: 2, 1, 1>} : memref<18x17x64xf32, #tpu.memory_space<vmem>>, vector<8x8x64xf32>
    %58 = vector.shape_cast %57 : vector<8x8x64xf32> to vector<64x64xf32>
    %c2_74 = arith.constant 2 : index
    %c1_75 = arith.constant 1 : index
    %c0_76 = arith.constant 0 : index
    %c0_77 = arith.constant 0 : index
    %59 = vector.load %arg2[%c2_74, %c1_75, %c0_76, %c0_77] : memref<3x3x64x32xf32, #tpu.memory_space<vmem>>, vector<1x1x64x32xf32>
    %60 = vector.shape_cast %59 : vector<1x1x64x32xf32> to vector<64x32xf32>
    %cst_78 = arith.constant dense<0.000000e+00> : vector<64x32xf32>
    %61 = tpu.matmul %58, %60, %cst_78 {dimension_numbers = #tpu.dot_dimension_numbers<[1], [0], [0], [1], [0, 0, 1, 1], [], []>} : vector<64x64xf32>, vector<64x32xf32>, vector<64x32xf32> -> vector<64x32xf32>
    %62 = arith.addf %56, %61 : vector<64x32xf32>
    %c2_79 = arith.constant 2 : index
    %c9_80 = arith.constant 9 : index
    %c0_81 = arith.constant 0 : index
    %63 = tpu.strided_load %arg5[%c2_79, %c9_80, %c0_81] {strides = array<i32: 2, 1, 1>} : memref<18x17x64xf32, #tpu.memory_space<vmem>>, vector<8x8x64xf32>
    %64 = vector.shape_cast %63 : vector<8x8x64xf32> to vector<64x64xf32>
    %c2_82 = arith.constant 2 : index
    %c2_83 = arith.constant 2 : index
    %c0_84 = arith.constant 0 : index
    %c0_85 = arith.constant 0 : index
    %65 = vector.load %arg2[%c2_82, %c2_83, %c0_84, %c0_85] : memref<3x3x64x32xf32, #tpu.memory_space<vmem>>, vector<1x1x64x32xf32>
    %66 = vector.shape_cast %65 : vector<1x1x64x32xf32> to vector<64x32xf32>
    %cst_86 = arith.constant dense<0.000000e+00> : vector<64x32xf32>
    %67 = tpu.matmul %64, %66, %cst_86 {dimension_numbers = #tpu.dot_dimension_numbers<[1], [0], [0], [1], [0, 0, 1, 1], [], []>} : vector<64x64xf32>, vector<64x32xf32>, vector<64x32xf32> -> vector<64x32xf32>
    %68 = arith.addf %62, %67 : vector<64x32xf32>
    %69 = vector.broadcast %13 : vector<1x32xf32> to vector<64x32xf32>
    %70 = arith.addf %68, %69 : vector<64x32xf32>
    %cst_87 = arith.constant 0.000000e+00 : f32
    %71 = vector.broadcast %cst_87 : f32 to vector<64x32xf32>
    %72 = arith.maximumf %70, %71 : vector<64x32xf32>
    %73 = vector.shape_cast %72 : vector<64x32xf32> to vector<8x8x32xf32>
    %c0_88 = arith.constant 0 : index
    %c0_89 = arith.constant 0 : index
    %c0_90 = arith.constant 0 : index
    %c0_91 = arith.constant 0 : index
    %74 = vector.load %arg4[%c0_88, %c0_89, %c0_90, %c0_91] : memref<1x8x8x32xf32, #tpu.memory_space<vmem>>, vector<1x8x8x32xf32>
    %75 = vector.shape_cast %74 : vector<1x8x8x32xf32> to vector<8x8x32xf32>
    %76 = vector.shape_cast %73 : vector<8x8x32xf32> to vector<1x8x8x32xf32>
    tpu.vector_store %arg4[%c0_88, %c0_89, %c0_90, %c0_91], %76 {strides = array<i32>} : memref<1x8x8x32xf32, #tpu.memory_space<vmem>>, vector<1x8x8x32xf32>,
    return
  }
  func.func @transform_0(%arg0: i32) -> (i32, i32, i32, i32) {
    %c0_i32 = arith.constant 0 : i32
    %c0_i32_0 = arith.constant 0 : i32
    %c0_i32_1 = arith.constant 0 : i32
    %c0_i32_2 = arith.constant 0 : i32
    return %arg0, %c0_i32, %c0_i32_0, %c0_i32_1 : i32, i32, i32, i32
  }
  func.func @transform_1(%arg0: i32) -> (i32, i32, i32, i32) {
    %c0_i32 = arith.constant 0 : i32
    %c0_i32_0 = arith.constant 0 : i32
    %c0_i32_1 = arith.constant 0 : i32
    %c0_i32_2 = arith.constant 0 : i32
    %c0_i32_3 = arith.constant 0 : i32
    return %c0_i32, %c0_i32_0, %c0_i32_1, %c0_i32_2 : i32, i32, i32, i32
  }
  func.func @transform_2(%arg0: i32) -> (i32, i32) {
    %c0_i32 = arith.constant 0 : i32
    %c0_i32_0 = arith.constant 0 : i32
    %c0_i32_1 = arith.constant 0 : i32
    return %c0_i32, %c0_i32_0 : i32, i32
  }
  func.func @transform_3(%arg0: i32) -> (i32, i32, i32, i32) {
    %c0_i32 = arith.constant 0 : i32
    %c0_i32_0 = arith.constant 0 : i32
    %c0_i32_1 = arith.constant 0 : i32
    %c0_i32_2 = arith.constant 0 : i32
    return %arg0, %c0_i32, %c0_i32_0, %c0_i32_1 : i32, i32, i32, i32
  }
}

</mosaic_0001>

<bundles_post_ra>
// kernel: tpu_custom_call.1
= control target key start
LH: loop header
LB: loop body
LE: loop exit
PB: predicated region body
PF: predicated region fallthrough
CT: control target
= control target key end

     0   :  { %8 = vsyncpa [#allocation4], 0  ;;  %s2094_s0 = inlined_call_operand.vmem [shape: f32[2,16,8,64], index: 0, kind: input, shape index: {}]   ;;  %s2095_s1 = inlined_call_operand.vmem [shape: f32[3,3,64,32], index: 1, kind: input, shape index: {}]   ;;  %s2096_s2 = inlined_call_operand.vmem [shape: f32[1,32], index: 2, kind: input, shape index: {}]   ;;  %s2097_s3 = inlined_call_operand.hbm [shape: f32[2,8,8,32], index: 3, kind: output, shape index: {}]  }
   0x1   :  { %10 = vsyncpa [#allocation4 + $0x1], 0  ;;  %s1452_s12 = smov 0   ;;  %s1454_s13 = smov 0  }
   0x2   :  { %s1456_s14 = smov 0   ;;  %s1458_s15 = smov 0  }
   0x3 LB: > { %s1473_s16 = sadd.s32 4294967295, %s1427_s15   ;;  %s1148_s17 = sadd.s32 4294967294, %s1427_s15   ;;  %s1427_s15 = sphi %s1458_s15, %s2103_s15   ;;  %s1423_s14 = sphi %s1456_s14, %s2102_s14   ;;  %s1419_s13 = sphi %s1454_s13, %s2101_s13   ;;  %s1415_s12 = sphi %s1452_s12, %s2100_s12  }
   0x4   : > { %s1477_s18 = sadd.s32 1, %s1427_s15   ;;  %s91_s19 = sadd.s32 1, %s1423_s14 }
   0x5   : > { %s88_s20 = ssub.s32 %s1427_s15, %s1477_s18  ;;  %p101_p0 = scmp.ne.s32.totalorder %s1423_s14, %s1419_s13 }
   0x6   : > { %p89_p1 = scmp.eq.s32.totalorder %s88_s20, 0  ;;  %p102_p2 = scmp.eq.s32.totalorder %s1473_s16, 1 }
   0x7   : > { %p107_p3 = scmp.ne.s32.totalorder %s1419_s13, %s1415_s12  ;;  %p108_p4 = scmp.eq.s32.totalorder %s1148_s17, 1 }
   0x8   : > { %s1488_s21 = scalar_select %p89_p1, %s1423_s14, %s91_s19  }
   0x9   : > { %p1490_p5 = por %p102_p2, %p101_p0  ;;  %p1494_p6 = por %p108_p4, %p107_p3 }
   0xa   : > { %p1151_p7 = scmp.ge.s32.totalorder %s1427_s15, 1  ;;  %p140_p8 = scmp.lt.s32.totalorder %s1427_s15, 3 }
   0xc   : > { %p141_p9 = pnand %p1151_p7, %p140_p8 }
   0xd   : > { %p164_p10 = scmp.lt.s32.totalorder (!%p141_p9), %s1473_s16, 1  ;;  %s1297_s20 = sshll.u32 (!%p141_p9), %s1473_s16, 6 }
   0xe   : > { %144 = sbr.rel (%p141_p9) target bundleno = 336 (0x150), region = 32  ;;  %s1082_s26 = scalar_lea.hbm (!%p141_p9), %s2097_s3, %s1297_s20 }
   0xf   : > { %s1085_s28 = sshll.u32 (!%p141_p9), %s1082_s26, 4  ;;  %s1086_s28 = int_to_ptr.hbm [resolvable:$true] %s1085_s28 }
  0x10   : > { %s1379_s29 = sshra.s32 (!%p141_p9), %s1086_s28, 4  ;;  %s1380_s29 = int_to_ptr.hbm [resolvable:$true] %s1379_s29 }
  0x11   : > { %p1386_p0 = scmp.lt.s32.totalorder (!%p141_p9), %s1380_s29, %s2097_s3 }
  0x13   : > { %v1162_v0 = vld [vmem:[%s2095_s1 + $0x78] sm:$0xff]  ;;  %v1161_v1 = vld [vmem:[%s2095_s1 + $0x70] sm:$0xff]  ;;  %vm169_vm0 = vcmask 523264   ;;  %v1429_v2 = vmov 0.0   ;;  %v1160_v3 = vld [vmem:[%s2095_s1 + $0x68] sm:$0xff]  ;;  %s165_s30 = scalar_select %p164_p10, %s1473_s16, 1 }
  0x14   : > { %1298 = vmatpush.msra.mxu1 %v1162_v0  ;;  %1299 = vmatpush.msra.mxu2 %v1162_v0  ;;  %171 = vst.msk [vmem:[#allocation2 + $0x8] sm:$0xff] %vm169_vm0, %v1429_v2  ;;  %vm172_vm1 = vcmask 516096   ;;  %v1159_v4 = vld [vmem:[%s2095_s1 + $0x60] sm:$0xff]  ;;  %v1158_v5 = vld [vmem:[%s2095_s1 + $0x58] sm:$0xff]  ;;  %v1157_v10 = vld [vmem:[%s2095_s1 + $0x50] sm:$0xff]  ;;  %vm1061_vm2 = vcmask 261120  }
  0x15   : > { %1300 = vmatpush.msra.mxu3 %v1162_v0  ;;  %313 = vmatpush.msra.mxu0 %v1162_v0  ;;  %s1296_s6 = sshll.u32 %s165_s30, 7  ;;  %170 = vst.msk [vmem:[#allocation2] sm:$0xff] %vm169_vm0, %v1429_v2  ;;  %v1156_v13 = vld [vmem:[%s2095_s1 + $0x48] sm:$0xff]  ;;  %v1155_v14 = vld [vmem:[%s2095_s1 + $0x40] sm:$0xff]  ;;  %v1186_v16 = vld [vmem:[%s2095_s1 + $0xb8] sm:$0xff]  ;;  %s1381_s30 = scalar_lea.hbm %s1380_s29, 64 }
  0x16   : > { %1301 = vmatpush.msra.mxu1 %v1161_v1  ;;  %1302 = vmatpush.msra.mxu2 %v1161_v1  ;;  %s1524_s11 = scalar_lea.vmem %s2094_s0, %s1296_s6  ;;  %178 = vst.msk [vmem:[#allocation2 + $0x7] sm:$0x1] %vm172_vm1, %v1429_v2  ;;  %v263_v18 = vld [vmem:[%s2095_s1 + $0x38] sm:$0xff]  ;;  %v1185_v20 = vld [vmem:[%s2095_s1 + $0xb0] sm:$0xff]  ;;  %v1184_v23 = vld [vmem:[%s2095_s1 + $0xa8] sm:$0xff]  ;;  %p1382_p11 = scmp.ne.s32.totalorder %s1380_s29, %s1381_s30 }
  0x17   : > { %1303 = vmatpush.msra.mxu3 %v1161_v1  ;;  %314 = vmatpush.msra.mxu0 %v1161_v1  ;;  %v217_v6 = vld [vmem:[%s1524_s11 + $0x18] sm:$0xff]  ;;  %173 = vst.msk [vmem:[#allocation2 + $0x10] sm:$0x1] %vm172_vm1, %v1429_v2  ;;  %v219_v9 = vld [vmem:[%s1524_s11 + $0x28] sm:$0xff]  ;;  %v262_v22 = vld [vmem:[%s2095_s1 + $0x30] sm:$0xff]  ;;  %s1385_s6 = scalar_lea.hbm %s2097_s3, 128 }
  0x18   : > { %1304 = vmatpush.msra.mxu1 %v1160_v3  ;;  %1305 = vmatpush.msra.mxu2 %v1160_v3  ;;  %v221_v7 = vld [vmem:[%s1524_s11 + $0x38] sm:$0xff]  ;;  %234 = vst.msk [vmem:[#allocation2 + $0x68] sm:$0xff] %vm169_vm0, %v217_v6  ;;  %v223_v11 = vld [vmem:[%s1524_s11 + $0x48] sm:$0xff]  ;;  %v1201_v24 = vld [vmem:[%s2095_s1 + $0xf0] sm:$0xff]  ;;  %p1383_p12 = pnand %p1382_p11, %p1490_p5  ;;  %p1387_p1 = scmp.lt.s32.totalorder %s1385_s6, %s1381_s30 }
  0x19   : > { %1306 = vmatpush.msra.mxu3 %v1160_v3  ;;  %315 = vmatpush.msra.mxu0 %v1160_v3  ;;  %v225_v8 = vld [vmem:[%s1524_s11 + $0x58] sm:$0xff]  ;;  %238 = vst.msk [vmem:[#allocation2 + $0xc8] sm:$0xff] %vm169_vm0, %v221_v7  ;;  %v227_v12 = vld [vmem:[%s1524_s11 + $0x68] sm:$0xff]  ;;  %v1183_v27 = vld [vmem:[%s2095_s1 + $0xa0] sm:$0xff] }
  0x1a   : > { %1307 = vmatpush.msra.mxu1 %v1159_v4  ;;  %1308 = vmatpush.msra.mxu2 %v1159_v4  ;;  %242 = vst.msk [vmem:[#allocation2 + $0x128] sm:$0xff] %vm169_vm0, %v225_v8  ;;  %v1202_v21 = vld [vmem:[%s2095_s1 + $0xf8] sm:$0xff]  ;;  %v261_v25 = vld [vmem:[%s2095_s1 + $0x28] sm:$0xff]  ;;  %v260_v29 = vld [vmem:[%s2095_s1 + $0x20] sm:$0xff]  ;;  %p1384_p13 = pneg %p1383_p12  ;;  %p1388_p2 = por %p1387_p1, %p1386_p0 }
  0x1b   : > { %1309 = vmatpush.msra.mxu3 %v1159_v4  ;;  %316 = vmatpush.msra.mxu0 %v1159_v4  ;;  %236 = vst.msk [vmem:[#allocation2 + $0x98] sm:$0xff] %vm169_vm0, %v219_v9  ;;  %v264_v26 = vld [vmem:[#allocation2 + $0x8] sm:$0xff]  ;;  %v1182_v32 = vld [vmem:[%s2095_s1 + $0x98] sm:$0xff]  ;;  %v1199_v33 = vld [vmem:[%s2095_s1 + $0xe0] sm:$0xff] }
  0x1c   : > { %1310 = vmatpush.msra.mxu1 %v1158_v5  ;;  %1311 = vmatpush.msra.mxu2 %v1158_v5  ;;  %240 = vst.msk [vmem:[#allocation2 + $0xf8] sm:$0xff] %vm169_vm0, %v223_v11  ;;  %v1200_v28 = vld [vmem:[%s2095_s1 + $0xe8] sm:$0xff]  ;;  %v259_v34 = vld [vmem:[%s2095_s1 + $0x18] sm:$0xff]  ;;  %v1181_v36 = vld [vmem:[%s2095_s1 + $0x90] sm:$0xff]  ;;  %p1389_p3 = pnand %p1388_p2, %p1384_p13 }
  0x1d   : > { %1312 = vmatpush.msra.mxu3 %v1158_v5  ;;  %317 = vmatpush.msra.mxu0 %v1158_v5  ;;  %244 = vst.msk [vmem:[#allocation2 + $0x158] sm:$0xff] %vm169_vm0, %v227_v12  ;;  %v1198_v37 = vld [vmem:[%s2095_s1 + $0xd8] sm:$0xff]  ;;  %v258_v39 = vld [vmem:[%s2095_s1 + $0x10] sm:$0xff]  ;;  %v1180_v40 = vld [vmem:[%s2095_s1 + $0x88] sm:$0xff] }
  0x1e   : > { %1313 = vmatpush.msra.mxu1 %v1157_v10  ;;  %1314 = vmatpush.msra.mxu2 %v1157_v10  ;;  %179 = vst.msk [vmem:[#allocation2 + $0x1f] sm:$0x1] %vm172_vm1, %v1429_v2  ;;  %v1218_v38 = vld [vmem:[%s2095_s1 + $0x138] sm:$0xff]  ;;  %v1197_v41 = vld [vmem:[%s2095_s1 + $0xd0] sm:$0xff]  ;;  %v257_v43 = vld [vmem:[%s2095_s1 + $0x8] sm:$0xff] }
  0x1f   : > { %1315 = vmatpush.msra.mxu3 %v1157_v10  ;;  %318 = vmatpush.msra.mxu0 %v1157_v10  ;;  %v1551_v15 = vld [vmem:[#allocation2 + $0x68] sm:$0xff]  ;;  %180 = vst.msk [vmem:[#allocation2 + $0x37] sm:$0x1] %vm172_vm1, %v1429_v2  ;;  %v1217_v42 = vld [vmem:[%s2095_s1 + $0x130] sm:$0xff]  ;;  %v1179_v44 = vld [vmem:[%s2095_s1 + $0x80] sm:$0xff] }
  0x20   : > { %1316 = vmatpush.msra.mxu1 %v1156_v13  ;;  %1317 = vmatpush.msra.mxu2 %v1156_v13  ;;  %v1558_v17 = vld [vmem:[#allocation2 + $0xc8] sm:$0xff]  ;;  %181 = vst.msk [vmem:[#allocation2 + $0x4f] sm:$0x1] %vm172_vm1, %v1429_v2  ;;  %v256_v47 = vld [vmem:[%s2095_s1] sm:$0xff]  ;;  %v1250_v48 = vld [vmem:[%s2095_s1 + $0x1b8] sm:$0xff] }
  0x21   : > { %1318 = vmatpush.msra.mxu3 %v1156_v13  ;;  %319 = vmatpush.msra.mxu0 %v1156_v13  ;;  %v1569_v19 = vld [vmem:[#allocation2 + $0x128] sm:$0xff]  ;;  %182 = vst.msk [vmem:[#allocation2 + $0x67] sm:$0x1] %vm172_vm1, %v1429_v2  ;;  %v1195_v50 = vld [vmem:[%s2095_s1 + $0xc0] sm:$0xff]  ;;  %v1266_v52 = vld [vmem:[%s2095_s1 + $0x1f8] sm:$0xff] }
  0x22   : > { %1319 = vmatpush.msra.mxu1 %v1155_v14  ;;  %1320 = vmatpush.msra.mxu2 %v1155_v14  ;;  %183 = vst.msk [vmem:[#allocation2 + $0x7f] sm:$0x1] %vm172_vm1, %v1429_v2  ;;  %v1614_v31 = vld [vmem:[#allocation2 + $0x98] sm:$0xff]  ;;  %v1196_v45 = vld [vmem:[%s2095_s1 + $0xc8] sm:$0xff]  ;;  %v1215_v51 = vld [vmem:[%s2095_s1 + $0x120] sm:$0xff] }
  0x23   : > { %1165 = vmatmul.msk.f32.vlgmr.msra.gmra.mxu1 %vm169_vm0, %v1551_v15  ;;  %1167 = vmatmul.msk.f32.vlgmr.msra.gmra.mxu2 %vm169_vm0, %v1558_v17  ;;  %184 = vst.msk [vmem:[#allocation2 + $0x97] sm:$0x1] %vm172_vm1, %v1429_v2  ;;  %v1610_v30 = vld [vmem:[#allocation2 + $0xf8] sm:$0xff]  ;;  %v1216_v46 = vld [vmem:[%s2095_s1 + $0x128] sm:$0xff]  ;;  %v1249_v54 = vld [vmem:[%s2095_s1 + $0x1b0] sm:$0xff] }
  0x24   : > { %460 = vmatpush.msrb.mxu2 %v1186_v16  ;;  %1321 = vmatpush.msra.mxu3 %v1155_v14  ;;  %185 = vst.msk [vmem:[#allocation2 + $0xaf] sm:$0x1] %vm172_vm1, %v1429_v2  ;;  %v1632_v35 = vld [vmem:[#allocation2 + $0x158] sm:$0xff]  ;;  %v248_v49 = vld [vmem:[#allocation2 + $0x7] sm:$0xff]  ;;  %v1265_v56 = vld [vmem:[%s2095_s1 + $0x1f0] sm:$0xff] }
  0x25   : > { %378 = vmatpush.msrb.mxu1 %v263_v18  ;;  %1169 = vmatmul.msk.f32.vlgmr.msra.gmra.mxu3 %vm169_vm0, %v1569_v19  ;;  %186 = vst.msk [vmem:[#allocation2 + $0xc7] sm:$0x1] %vm172_vm1, %v1429_v2  ;;  %v1234_v53 = vld [vmem:[%s2095_s1 + $0x178] sm:$0xff]  ;;  %v1233_v57 = vld [vmem:[%s2095_s1 + $0x170] sm:$0xff]  ;;  %v1212_v59 = vld [vmem:[%s2095_s1 + $0x108] sm:$0xff] }
  0x26   : > { %461 = vmatpush.msrb.mxu2 %v1185_v20  ;;  %550 = vmatpush.msrb.mxu3 %v1202_v21  ;;  %187 = vst.msk [vmem:[#allocation2 + $0xdf] sm:$0x1] %vm172_vm1, %v1429_v2  ;;  %v1214_v55 = vld [vmem:[%s2095_s1 + $0x118] sm:$0xff]  ;;  %v1213_v58 = vld [vmem:[%s2095_s1 + $0x110] sm:$0xff]  ;;  %v1248_v60 = vld [vmem:[%s2095_s1 + $0x1a8] sm:$0xff] }
  0x27   : > { %379 = vmatpush.msrb.mxu1 %v262_v22  ;;  %320 = vmatpush.msra.mxu0 %v1155_v14  ;;  %188 = vst.msk [vmem:[#allocation2 + $0xf7] sm:$0x1] %vm172_vm1, %v1429_v2  ;;  %v1211_v61 = vld [vmem:[%s2095_s1 + $0x100] sm:$0xff]  ;;  %v1282_v62 = vld [vmem:[%s2095_s1 + $0x238] sm:$0xff]  ;;  %v1264_v63 = vld [vmem:[%s2095_s1 + $0x1e8] sm:$0xff] }
  0x28   : > { %462 = vmatpush.msrb.mxu2 %v1184_v23  ;;  %551 = vmatpush.msrb.mxu3 %v1201_v24  ;;  %189 = vst.msk [vmem:[#allocation2 + $0x10f] sm:$0x1] %vm172_vm1, %v1429_v2  ;;  %v1232_v0 = vld [vmem:[%s2095_s1 + $0x168] sm:$0xff]  ;;  %v1281_v1 = vld [vmem:[%s2095_s1 + $0x230] sm:$0xff]  ;;  %v214_v4 = vld [vmem:[%s1524_s11] sm:$0xff] }
  0x29   : > { %380 = vmatpush.msrb.mxu1 %v261_v25  ;;  %1163 = vmatmul.msk.f32.vlgmr.msra.gmra.mxu0 %vm169_vm0, %v264_v26  ;;  %190 = vst.msk [vmem:[#allocation2 + $0x127] sm:$0x1] %vm172_vm1, %v1429_v2  ;;  %v215_v3 = vld [vmem:[%s1524_s11 + $0x8] sm:$0xff]  ;;  %v1247_v5 = vld [vmem:[%s2095_s1 + $0x1a0] sm:$0xff]  ;;  %v216_v6 = vld [vmem:[%s1524_s11 + $0x10] sm:$0xff] }
  0x2a   : > { %463 = vmatpush.msrb.mxu2 %v1183_v27  ;;  %552 = vmatpush.msrb.mxu3 %v1200_v28  ;;  %191 = vst.msk [vmem:[#allocation2 + $0x13f] sm:$0x1] %vm172_vm1, %v1429_v2  ;;  %v218_v7 = vld [vmem:[%s1524_s11 + $0x20] sm:$0xff]  ;;  %v220_v8 = vld [vmem:[%s1524_s11 + $0x30] sm:$0xff]  ;;  %v1246_v13 = vld [vmem:[%s2095_s1 + $0x198] sm:$0xff] }
  0x2b   : > { %381 = vmatpush.msrb.mxu1 %v260_v29  ;;  %1168 = vmatmul.msk.f32.gmra.mxu2 %vm169_vm0, %v1610_v30  ;;  %192 = vst.msk [vmem:[#allocation2 + $0x157] sm:$0x1] %vm172_vm1, %v1429_v2  ;;  %v1263_v9 = vld [vmem:[%s2095_s1 + $0x1e0] sm:$0xff]  ;;  %v224_v20 = vld [vmem:[%s1524_s11 + $0x50] sm:$0xff]  ;;  %v1262_v21 = vld [vmem:[%s2095_s1 + $0x1d8] sm:$0xff] }
  0x2c   : > { %1166 = vmatmul.msk.f32.gmra.mxu1 %vm169_vm0, %v1614_v31  ;;  %464 = vmatpush.msrb.mxu2 %v1182_v32  ;;  %193 = vst.msk [vmem:[#allocation2 + $0x16f] sm:$0x1] %vm172_vm1, %v1429_v2  ;;  %v1231_v10 = vld [vmem:[%s2095_s1 + $0x160] sm:$0xff]  ;;  %v1230_v24 = vld [vmem:[%s2095_s1 + $0x158] sm:$0xff]  ;;  %v1245_v28 = vld [vmem:[%s2095_s1 + $0x190] sm:$0xff] }
  0x2d   : > { %553 = vmatpush.msrb.mxu3 %v1199_v33  ;;  %382 = vmatpush.msrb.mxu1 %v259_v34  ;;  %194 = vst.msk [vmem:[#allocation2 + $0x187] sm:$0x1] %vm172_vm1, %v1429_v2  ;;  %v222_v11 = vld [vmem:[%s1524_s11 + $0x40] sm:$0xff]  ;;  %v1261_v32 = vld [vmem:[%s2095_s1 + $0x1d0] sm:$0xff]  ;;  %v1278_v33 = vld [vmem:[%s2095_s1 + $0x218] sm:$0xff] }
  0x2e   : > { %1170 = vmatmul.msk.f32.gmra.mxu3 %vm169_vm0, %v1632_v35  ;;  %465 = vmatpush.msrb.mxu2 %v1181_v36  ;;  %197 = vst.msk [vmem:[#allocation2 + $0x28] sm:$0x1] %vm172_vm1, %v1429_v2  ;;  %v1279_v22 = vld [vmem:[%s2095_s1 + $0x220] sm:$0xff]  ;;  %v1229_v34 = vld [vmem:[%s2095_s1 + $0x150] sm:$0xff] }
  0x2f   : > { %554 = vmatpush.msrb.mxu3 %v1198_v37  ;;  %640 = vmatpush.msrb.mxu0 %v1218_v38  ;;  %198 = vst.msk [vmem:[#allocation2 + $0x40] sm:$0x1] %vm172_vm1, %v1429_v2  ;;  %v1822_v26 = vld [vmem:[#allocation2 + $0x67] sm:$0xff]  ;;  %v1846_v38 = vld [vmem:[#allocation2 + $0x97] sm:$0xff] }
  0x30   : > { %383 = vmatpush.msrb.mxu1 %v258_v39  ;;  %466 = vmatpush.msrb.mxu2 %v1180_v40  ;;  %199 = vst.msk [vmem:[#allocation2 + $0x58] sm:$0x1] %vm172_vm1, %v1429_v2  ;;  %v226_v29 = vld [vmem:[%s1524_s11 + $0x60] sm:$0xff]  ;;  %v1244_v40 = vld [vmem:[%s2095_s1 + $0x188] sm:$0xff] }
  0x31   : > { %555 = vmatpush.msrb.mxu3 %v1197_v41  ;;  %641 = vmatpush.msrb.mxu0 %v1217_v42  ;;  %200 = vst.msk [vmem:[#allocation2 + $0x70] sm:$0x1] %vm172_vm1, %v1429_v2  ;;  %v228_v41 = vld [vmem:[%s1524_s11 + $0x70] sm:$0xff]  ;;  %v1260_v42 = vld [vmem:[%s2095_s1 + $0x1c8] sm:$0xff] }
  0x32   : > { %384 = vmatpush.msrb.mxu1 %v257_v43  ;;  %467 = vmatpush.msrb.mxu2 %v1179_v44  ;;  %201 = vst.msk [vmem:[#allocation2 + $0x88] sm:$0x1] %vm172_vm1, %v1429_v2  ;;  %v1277_v43 = vld [vmem:[%s2095_s1 + $0x210] sm:$0xff]  ;;  %v1228_v44 = vld [vmem:[%s2095_s1 + $0x148] sm:$0xff] }
  0x33   : > { %556 = vmatpush.msrb.mxu3 %v1196_v45  ;;  %642 = vmatpush.msrb.mxu0 %v1216_v46  ;;  %202 = vst.msk [vmem:[#allocation2 + $0xa0] sm:$0x1] %vm172_vm1, %v1429_v2 }
  0x34   : > { %385 = vmatpush.msrb.mxu1 %v256_v47  ;;  %821 = vmatpush.msra.mxu2 %v1250_v48  ;;  %203 = vst.msk [vmem:[#allocation2 + $0xb8] sm:$0x1] %vm172_vm1, %v1429_v2  ;;  %v1870_v47 = vld [vmem:[#allocation2 + $0xc7] sm:$0xff] }
  0x35   : > { %1171 = vmatmul.msk.f32.vlgmr.msrb.gmra.mxu1 %vm169_vm0, %v248_v49  ;;  %557 = vmatpush.msrb.mxu3 %v1195_v50  ;;  %204 = vst.msk [vmem:[#allocation2 + $0xd0] sm:$0x1] %vm172_vm1, %v1429_v2  ;;  %v1243_v49 = vld [vmem:[%s2095_s1 + $0x180] sm:$0xff] }
  0x36   : > { %643 = vmatpush.msrb.mxu0 %v1215_v51  ;;  %730 = vmatpush.msra.mxu1 %v1234_v53  ;;  %205 = vst.msk [vmem:[#allocation2 + $0xe8] sm:$0x1] %vm172_vm1, %v1429_v2  ;;  %v1259_v50 = vld [vmem:[%s2095_s1 + $0x1c0] sm:$0xff]  ;;  %v1276_v51 = vld [vmem:[%s2095_s1 + $0x208] sm:$0xff] }
  0x37   : > { %911 = vmatpush.msra.mxu3 %v1266_v52  ;;  %822 = vmatpush.msra.mxu2 %v1249_v54  ;;  %206 = vst.msk [vmem:[#allocation2 + $0x100] sm:$0x1] %vm172_vm1, %v1429_v2  ;;  %v1227_v52 = vld [vmem:[%s2095_s1 + $0x140] sm:$0xff] }
  0x38   : > { %644 = vmatpush.msrb.mxu0 %v1214_v55  ;;  %731 = vmatpush.msra.mxu1 %v1233_v57  ;;  %207 = vst.msk [vmem:[#allocation2 + $0x118] sm:$0x1] %vm172_vm1, %v1429_v2  ;;  %v1844_v36 = vld [vmem:[#allocation2 + $0x69] sm:$0xff]  ;;  %v253_v55 = vld [vmem:[#allocation2 + $0xf7] sm:$0xff]  ;;  %v1275_v57 = vld [vmem:[%s2095_s1 + $0x200] sm:$0xff] }
  0x39   : > { %912 = vmatpush.msra.mxu3 %v1265_v56  ;;  %823 = vmatpush.msra.mxu2 %v1248_v60  ;;  %208 = vst.msk [vmem:[#allocation2 + $0x130] sm:$0x1] %vm172_vm1, %v1429_v2  ;;  %v254_v60 = vld [vmem:[#allocation2 + $0x127] sm:$0xff] }
  0x3a   : > { %645 = vmatpush.msrb.mxu0 %v1213_v58  ;;  %209 = vst.msk [vmem:[#allocation2 + $0x148] sm:$0x1] %vm172_vm1, %v1429_v2  ;;  %732 = vmatpush.msra.mxu1 %v1232_v0  ;;  %v1868_v45 = vld [vmem:[#allocation2 + $0x99] sm:$0xff] }
  0x3b   : > { %913 = vmatpush.msra.mxu3 %v1264_v63  ;;  %210 = vst.msk [vmem:[#allocation2 + $0x160] sm:$0x1] %vm172_vm1, %v1429_v2  ;;  %824 = vmatpush.msra.mxu2 %v1247_v5  ;;  %v255_v0 = vld [vmem:[#allocation2 + $0x157] sm:$0xff] }
  0x3c   : > { %646 = vmatpush.msrb.mxu0 %v1212_v59  ;;  %211 = vst.msk [vmem:[#allocation2 + $0x178] sm:$0x1] %vm172_vm1, %v1429_v2  ;;  %733 = vmatpush.msra.mxu1 %v1231_v10  ;;  %v415_v53 = vld [vmem:[#allocation2 + $0xc9] sm:$0xff]  ;;  %v229_v10 = vld [vmem:[%s1524_s11 + $0x78] sm:$0xff]  ;;  %s161_s11 = sand.u32 1, %s1419_s13  }
  0x3d   : > { %212 = vst.msk [vmem:[#allocation2 + $0x190] sm:$0x1] %vm172_vm1, %v1429_v2  ;;  %914 = vmatpush.msra.mxu3 %v1263_v9  ;;  %825 = vmatpush.msra.mxu2 %v1246_v13  ;;  %s1152_s17 = sshll.u32 %s161_s11, 6  ;;  %s1071_s16 = scalar_lea.sflag [#allocation4], %s161_s11 }
  0x3e   : > { %647 = vmatpush.msrb.mxu0 %v1211_v61  ;;  %196 = vst.msk [vmem:[#allocation2 + $0x10] sm:$0x1] %vm172_vm1, %v1429_v2  ;;  %v1280_v2 = vld [vmem:[%s2095_s1 + $0x228] sm:$0xff]  ;;  %734 = vmatpush.msra.mxu1 %v1230_v24  ;;  %v416_v58 = vld [vmem:[#allocation2 + $0xf9] sm:$0xff]  ;;  %s2014_s19 = scalar_lea.vmem [#allocation3], %s1152_s17 }
  0x3f   : > { %232 = vst.msk [vmem:[#allocation2 + $0x38] sm:$0xff] %vm169_vm0, %v215_v3  ;;  %915 = vmatpush.msra.mxu3 %v1262_v21  ;;  %826 = vmatpush.msra.mxu2 %v1245_v28  ;;  %s1083_s27 = sshll.u32 %s2014_s19, 4  ;;  %s1084_s27 = int_to_ptr.vmem [resolvable:$true] %s1083_s27 }
  0x40   : > { %1001 = vmatpush.msra.mxu0 %v1282_v62  ;;  %231 = vst.msk [vmem:[#allocation2 + $0x20] sm:$0xff] %vm169_vm0, %v214_v4  ;;  %735 = vmatpush.msra.mxu1 %v1229_v34  ;;  %v417_v62 = vld [vmem:[#allocation2 + $0x129] sm:$0xff] }
  0x41   : > { %233 = vst.msk [vmem:[#allocation2 + $0x50] sm:$0xff] %vm169_vm0, %v216_v6  ;;  %916 = vmatpush.msra.mxu3 %v1261_v32  ;;  %827 = vmatpush.msra.mxu2 %v1244_v40 }
  0x42   : > { %1002 = vmatpush.msra.mxu0 %v1281_v1  ;;  %235 = vst.msk [vmem:[#allocation2 + $0x80] sm:$0xff] %vm169_vm0, %v218_v7  ;;  %736 = vmatpush.msra.mxu1 %v1228_v44  ;;  %v418_v3 = vld [vmem:[#allocation2 + $0x159] sm:$0xff] }
  0x43   : > { %237 = vst.msk [vmem:[#allocation2 + $0xb0] sm:$0xff] %vm169_vm0, %v220_v8  ;;  %917 = vmatpush.msra.mxu3 %v1260_v42  ;;  %828 = vmatpush.msra.mxu2 %v1243_v49 }
  0x44   : > { %1003 = vmatpush.msra.mxu0 %v1280_v2  ;;  %239 = vst.msk [vmem:[#allocation2 + $0xe0] sm:$0xff] %vm169_vm0, %v222_v11  ;;  %737 = vmatpush.msra.mxu1 %v1227_v52 }
  0x45   : > { %v411_v12 = vld [vmem:[#allocation2 + $0x9] sm:$0xff]  ;;  %241 = vst.msk [vmem:[#allocation2 + $0x110] sm:$0xff] %vm169_vm0, %v224_v20  ;;  %918 = vmatpush.msra.mxu3 %v1259_v50 }
  0x46   : > { %1187 = vmatmul.msk.f32.vlgmr.msrb.gmra.mxu2 %vm169_vm0, %v411_v12  ;;  %v1800_v14 = vld [vmem:[#allocation2 + $0x38] sm:$0xff]  ;;  %1004 = vmatpush.msra.mxu0 %v1279_v22  ;;  %243 = vst.msk [vmem:[#allocation2 + $0x140] sm:$0xff] %vm169_vm0, %v226_v29 }
  0x47   : > { %v1802_v16 = vld [vmem:[#allocation2 + $0x37] sm:$0xff]  ;;  %1164 = vmatmul.msk.f32.gmra.mxu0 %vm169_vm0, %v1800_v14  ;;  %v501_v18 = vld [vmem:[#allocation2 + $0x1f] sm:$0xff]  ;;  %245 = vst.msk [vmem:[#allocation2 + $0x170] sm:$0xff] %vm169_vm0, %v228_v41 }
  0x48   : > { %1172 = vmatmul.msk.f32.gmra.mxu1 %vm169_vm0, %v1802_v16  ;;  %1203 = vmatmul.msk.f32.vlgmr.msrb.gmra.mxu3 %vm169_vm0, %v501_v18  ;;  %v1817_v23 = vld [vmem:[#allocation2 + $0x39] sm:$0xff]  ;;  %v502_v27 = vld [vmem:[#allocation2 + $0x4f] sm:$0xff]  ;;  %v681_v5 = vld [vmem:[#allocation2 + $0x21] sm:$0xff]  ;;  %246 = vst.msk [vmem:[#allocation2 + $0x188] sm:$0xff] %vm169_vm0, %v229_v10 }
  0x49   : > { %v591_v25 = vld [vmem:[#allocation2 + $0x20] sm:$0xff]  ;;  %1005 = vmatpush.msra.mxu0 %v1278_v33  ;;  %v592_v37 = vld [vmem:[#allocation2 + $0x50] sm:$0xff] }
  0x4a   : > { %v503_v39 = vld [vmem:[#allocation2 + $0x7f] sm:$0xff]  ;;  %v504_v48 = vld [vmem:[#allocation2 + $0xaf] sm:$0xff] }
  0x4b   : > { %1006 = vmatpush.msra.mxu0 %v1277_v43  ;;  %v593_v46 = vld [vmem:[#allocation2 + $0x80] sm:$0xff]  ;;  %v594_v54 = vld [vmem:[#allocation2 + $0xb0] sm:$0xff] }
  0x4c   : > { %v505_v56 = vld [vmem:[#allocation2 + $0xdf] sm:$0xff]  ;;  %v506_v61 = vld [vmem:[#allocation2 + $0x10f] sm:$0xff] }
  0x4d   : > { %1007 = vmatpush.msra.mxu0 %v1276_v51  ;;  %v595_v59 = vld [vmem:[#allocation2 + $0xe0] sm:$0xff]  ;;  %v596_v63 = vld [vmem:[#allocation2 + $0x110] sm:$0xff] }
  0x4e   : > { %1188 = vmatmul.msk.f32.gmra.mxu2 %vm169_vm0, %v1817_v23  ;;  %v507_v1 = vld [vmem:[#allocation2 + $0x13f] sm:$0xff]  ;;  %v508_v6 = vld [vmem:[#allocation2 + $0x16f] sm:$0xff] }
  0x4f   : > { %1219 = vmatmul.msk.f32.vlgmr.msrb.gmra.mxu0 %vm169_vm0, %v591_v25  ;;  %v597_v4 = vld [vmem:[#allocation2 + $0x140] sm:$0xff]  ;;  %v598_v7 = vld [vmem:[#allocation2 + $0x170] sm:$0xff] }
  0x50   : > { %1173 = vmatmul.msk.f32.gmra.mxu1 %vm169_vm0, %v1822_v26  ;;  %1204 = vmatmul.msk.f32.gmra.mxu3 %vm169_vm0, %v502_v27  ;;  %v682_v8 = vld [vmem:[#allocation2 + $0x51] sm:$0xff]  ;;  %v683_v9 = vld [vmem:[#allocation2 + $0x81] sm:$0xff]  ;;  %v959_v24 = vld [vmem:[#allocation2 + $0x189] sm:$0xff] }
  0x51   : > { %1008 = vmatpush.msra.mxu0 %v1275_v57  ;;  %v684_v2 = vld [vmem:[#allocation2 + $0xb1] sm:$0xff]  ;;  %v685_v11 = vld [vmem:[#allocation2 + $0xe1] sm:$0xff]  ;;  %v2008_v10 = vld [vmem:[%s2096_s2] ss:$0 sm:$0xff] }
  0x52   : > { %v779_v18 = vld [vmem:[#allocation2 + $0x187] sm:$0xff] }
  0x56   : > { %1189 = vmatmul.msk.f32.gmra.mxu2 %vm169_vm0, %v1844_v36 }
  0x57   : > { %1220 = vmatmul.msk.f32.gmra.mxu0 %vm169_vm0, %v592_v37 }
  0x58   : > { %1174 = vmatmul.msk.f32.gmra.mxu1 %vm169_vm0, %v1846_v38  ;;  %1205 = vmatmul.msk.f32.gmra.mxu3 %vm169_vm0, %v503_v39 }
  0x5e   : > { %1190 = vmatmul.msk.f32.gmra.mxu2 %vm169_vm0, %v1868_v45 }
  0x5f   : > { %1221 = vmatmul.msk.f32.gmra.mxu0 %vm169_vm0, %v593_v46 }
  0x60   : > { %1175 = vmatmul.msk.f32.gmra.mxu1 %vm169_vm0, %v1870_v47  ;;  %1206 = vmatmul.msk.f32.gmra.mxu3 %vm169_vm0, %v504_v48 }
  0x66   : > { %1191 = vmatmul.msk.f32.gmra.mxu2 %vm169_vm0, %v415_v53 }
  0x67   : > { %1222 = vmatmul.msk.f32.gmra.mxu0 %vm169_vm0, %v594_v54 }
  0x68   : > { %1176 = vmatmul.msk.f32.gmra.mxu1 %vm169_vm0, %v253_v55  ;;  %1207 = vmatmul.msk.f32.gmra.mxu3 %vm169_vm0, %v505_v56 }
  0x6e   : > { %1192 = vmatmul.msk.f32.gmra.mxu2 %vm169_vm0, %v416_v58 }
  0x6f   : > { %1223 = vmatmul.msk.f32.gmra.mxu0 %vm169_vm0, %v595_v59 }
  0x70   : > { %1177 = vmatmul.msk.f32.gmra.mxu1 %vm169_vm0, %v254_v60  ;;  %1208 = vmatmul.msk.f32.gmra.mxu3 %vm169_vm0, %v506_v61 }
  0x76   : > { %1193 = vmatmul.msk.f32.gmra.mxu2 %vm169_vm0, %v417_v62 }
  0x77   : > { %1224 = vmatmul.msk.f32.gmra.mxu0 %vm169_vm0, %v596_v63 }
  0x78   : > { %1178 = vmatmul.msk.f32.gmra.mxu1 %vm169_vm0, %v255_v0  ;;  %1209 = vmatmul.msk.f32.gmra.mxu3 %vm169_vm0, %v507_v1 }
  0x7e   : > { %1194 = vmatmul.msk.f32.gmra.mxu2 %vm169_vm0, %v418_v3 }
  0x7f   : > { %1225 = vmatmul.msk.f32.gmra.mxu0 %vm169_vm0, %v597_v4 }
  0x80   : > { %1235 = vmatmul.msk.f32.vlgmr.msra.gmra.mxu1 %vm169_vm0, %v681_v5  ;;  %1210 = vmatmul.msk.f32.gmra.mxu3 %vm169_vm0, %v508_v6 }
  0x86   : > { %1251 = vmatmul.msk.f32.vlgmr.msra.gmra.mxu2 %vm169_vm0, %v1802_v16 }
  0x87   : > { %1226 = vmatmul.msk.f32.gmra.mxu0 %vm169_vm0, %v598_v7 }
  0x88   : > { %1236 = vmatmul.msk.f32.gmra.mxu1 %vm169_vm0, %v682_v8  ;;  %1267 = vmatmul.msk.f32.vlgmr.msra.gmra.mxu3 %vm169_vm0, %v1800_v14  ;;  %v688_v14 = vld [vmem:[#allocation2 + $0x171] sm:$0xff] }
  0x8e   : > { %1252 = vmatmul.msk.f32.gmra.mxu2 %vm169_vm0, %v1822_v26 }
  0x8f   : > { %1283 = vmatmul.msk.f32.vlgmr.msra.gmra.mxu0 %vm169_vm0, %v1817_v23 }
  0x90   : > { %1237 = vmatmul.msk.f32.gmra.mxu1 %vm169_vm0, %v683_v9  ;;  %1268 = vmatmul.msk.f32.gmra.mxu3 %vm169_vm0, %v1551_v15  ;;  %v686_v15 = vld [vmem:[#allocation2 + $0x111] sm:$0xff] }
  0x96   : > { %1253 = vmatmul.msk.f32.gmra.mxu2 %vm169_vm0, %v1846_v38 }
  0x97   : > { %1284 = vmatmul.msk.f32.gmra.mxu0 %vm169_vm0, %v1844_v36 }
  0x98   : > { %1238 = vmatmul.msk.f32.gmra.mxu1 %vm169_vm0, %v684_v2  ;;  %1269 = vmatmul.msk.f32.gmra.mxu3 %vm169_vm0, %v1614_v31  ;;  %v687_v31 = vld [vmem:[#allocation2 + $0x141] sm:$0xff] }
  0x9e   : > { %1254 = vmatmul.msk.f32.gmra.mxu2 %vm169_vm0, %v1870_v47 }
  0x9f   : > { %1285 = vmatmul.msk.f32.gmra.mxu0 %vm169_vm0, %v1868_v45 }
  0xa0   : > { %1239 = vmatmul.msk.f32.gmra.mxu1 %vm169_vm0, %v685_v11  ;;  %1270 = vmatmul.msk.f32.gmra.mxu3 %vm169_vm0, %v1558_v17  ;;  %v1939_v12 = vpop.f32.mrf.mxu1 }
  0xa6   : > { %1255 = vmatmul.msk.f32.gmra.mxu2 %vm169_vm0, %v253_v55  ;;  %v1952_v13 = vpop.f32.mrf.mxu2  ;;  %v322_v16 = vpop.f32.mrf.mxu0 }
  0xa7   : > { %1286 = vmatmul.msk.f32.gmra.mxu0 %vm169_vm0, %v415_v53 }
  0xa8   : > { %1240 = vmatmul.msk.f32.gmra.mxu1 %vm169_vm0, %v686_v15  ;;  %1271 = vmatmul.msk.f32.gmra.mxu3 %vm169_vm0, %v1610_v30  ;;  %v1956_v30 = vpop.f32.mrf.mxu3 }
  0xa9   : > { %v1950_v17 = vpop.f32.mrf.mxu1 }
  0xae   : > { %1256 = vmatmul.msk.f32.gmra.mxu2 %vm169_vm0, %v254_v60  ;;  %v1962_v21 = vpop.f32.mrf.mxu2 }
  0xaf   : > { %1287 = vmatmul.msk.f32.gmra.mxu0 %vm169_vm0, %v416_v58 }
  0xb0   : > { %1241 = vmatmul.msk.f32.gmra.mxu1 %vm169_vm0, %v687_v31  ;;  %1272 = vmatmul.msk.f32.gmra.mxu3 %vm169_vm0, %v1569_v19  ;;  %v869_v19 = vld [vmem:[#allocation2 + $0x188] sm:$0xff] }
  0xb1   : > { %v1966_v22 = vpop.f32.mrf.mxu3 }
  0xb2   : > { %v387_v20 = vpop.f32.mrf.mxu1 }
  0xb3   : > { %v388_v53 = vadd.f32 %v387_v20, %v322_v16 }
  0xb6   : > { %1257 = vmatmul.msk.f32.gmra.mxu2 %vm169_vm0, %v255_v0 }
  0xb7   : > { %1288 = vmatmul.msk.f32.gmra.mxu0 %vm169_vm0, %v417_v62 }
  0xb8   : > { %1242 = vmatmul.msk.f32.gmra.mxu1 %vm169_vm0, %v688_v14  ;;  %1273 = vmatmul.msk.f32.gmra.mxu3 %vm169_vm0, %v1632_v35 }
  0xbe   : > { %1258 = vmatmul.msk.f32.gmra.mxu2 %vm169_vm0, %v779_v18 }
  0xbf   : > { %1289 = vmatmul.msk.f32.gmra.mxu0 %vm169_vm0, %v418_v3 }
  0xc0   : > { %1274 = vmatmul.msk.f32.gmra.mxu3 %vm169_vm0, %v869_v19 }
  0xc4   : > { %v325_v23 = vpop.f32.mrf.mxu0 }
  0xc5   : > { %v390_v25 = vpop.f32.mrf.mxu1 }
  0xc6   : > { %v391_v60 = vadd.f32 %v390_v25, %v325_v23 }
  0xc7   : > { %1290 = vmatmul.msk.f32.gmra.mxu0 %vm169_vm0, %v959_v24 }
  0xc9   : > { %v469_v35 = vpop.f32.mrf.mxu2 }
  0xca   : > { %v493_v57 = vadd.f32 %v469_v35, %v388_v53 }
  0xcb   : > { %v559_v26 = vpop.f32.mrf.mxu3 }
  0xcc   : > { %v649_v27 = vpop.f32.mrf.mxu0  ;;  %v583_v59 = vadd.f32 %v559_v26, %v493_v57 }
  0xcd   : > { %v393_v28 = vpop.f32.mrf.mxu1 }
  0xce   : > { %v673_v0 = vadd.f32 %v649_v27, %v583_v59  ;;  %v394_v7 = vadd.f32 %v393_v28, %v1939_v12 }
  0xd1   : > { %v472_v29 = vpop.f32.mrf.mxu2 }
  0xd2   : > { %v494_v1 = vadd.f32 %v472_v29, %v391_v60 }
  0xd3   : > { %v562_v32 = vpop.f32.mrf.mxu3 }
  0xd4   : > { %v652_v33 = vpop.f32.mrf.mxu0  ;;  %v584_v5 = vadd.f32 %v562_v32, %v494_v1 }
  0xd5   : > { %v396_v34 = vpop.f32.mrf.mxu1 }
  0xd6   : > { %v674_v15 = vadd.f32 %v652_v33, %v584_v5  ;;  %v397_v24 = vadd.f32 %v396_v34, %v1950_v17 }
  0xd9   : > { %v475_v36 = vpop.f32.mrf.mxu2 }
  0xda   : > { %v495_v31 = vadd.f32 %v475_v36, %v394_v7 }
  0xdb   : > { %v565_v37 = vpop.f32.mrf.mxu3 }
  0xdc   : > { %v655_v38 = vpop.f32.mrf.mxu0  ;;  %v585_v12 = vadd.f32 %v565_v37, %v495_v31 }
  0xdd   : > { %v1969_v39 = vpop.f32.mrf.mxu1 }
  0xde   : > { %v675_v28 = vadd.f32 %v655_v38, %v585_v12  ;;  %v400_v34 = vadd.f32 %v1969_v39, %v1952_v13 }
  0xe1   : > { %v478_v40 = vpop.f32.mrf.mxu2 }
  0xe2   : > { %v496_v29 = vadd.f32 %v478_v40, %v397_v24 }
  0xe3   : > { %v568_v41 = vpop.f32.mrf.mxu3 }
  0xe4   : > { %v1971_v42 = vpop.f32.mrf.mxu0  ;;  %v586_v53 = vadd.f32 %v568_v41, %v496_v29 }
  0xe5   : > { %v1973_v43 = vpop.f32.mrf.mxu1 }
  0xe6   : > { %v676_v38 = vadd.f32 %v1971_v42, %v586_v53  ;;  %v403_v39 = vadd.f32 %v1973_v43, %v1962_v21 }
  0xe9   : > { %v1975_v44 = vpop.f32.mrf.mxu2 }
  0xea   : > { %v497_v40 = vadd.f32 %v1975_v44, %v400_v34 }
  0xeb   : > { %v1977_v45 = vpop.f32.mrf.mxu3 }
  0xec   : > { %v1979_v46 = vpop.f32.mrf.mxu0 }
  0xed   : > { %v1981_v47 = vpop.f32.mrf.mxu1 }
  0xee   : > { %v406_v43 = vadd.f32 %v1981_v47, %v1956_v30 }
  0xf1   : > { %v1983_v48 = vpop.f32.mrf.mxu2 }
  0xf3   : > { %v1985_v49 = vpop.f32.mrf.mxu3 }
  0xf4   : > { %v1987_v50 = vpop.f32.mrf.mxu0 }
  0xf5   : > { %v1989_v51 = vpop.f32.mrf.mxu1 }
  0xf6   : > { %v409_v47 = vadd.f32 %v1989_v51, %v1966_v22 }
  0xf9   : > { %v1991_v52 = vpop.f32.mrf.mxu2 }
  0xfb   : > { %v1993_v54 = vpop.f32.mrf.mxu3 }
  0xfc   : > { %v1995_v55 = vpop.f32.mrf.mxu0 }
  0xfd   : > { %v739_v56 = vpop.f32.mrf.mxu1 }
  0xfe   : > { %v763_v3 = vadd.f32 %v739_v56, %v673_v0 }
 0x101   : > { %v1997_v58 = vpop.f32.mrf.mxu2 }
 0x103   : > { %v1999_v61 = vpop.f32.mrf.mxu3 }
 0x104   : > { %v2001_v62 = vpop.f32.mrf.mxu0 }
 0x105   : > { %v742_v63 = vpop.f32.mrf.mxu1 }
 0x106   : > { %v764_v16 = vadd.f32 %v742_v63, %v674_v15 }
 0x109   : > { %v830_v4 = vpop.f32.mrf.mxu2 }
 0x10a   : > { %v854_v6 = vadd.f32 %v830_v4, %v763_v3  ;;  %v587_v4 = vadd.f32 %v1977_v45, %v497_v40 }
 0x10b   : > { %v920_v8 = vpop.f32.mrf.mxu3 }
 0x10c   : > { %v944_v9 = vadd.f32 %v920_v8, %v854_v6  ;;  %v1010_v2 = vpop.f32.mrf.mxu0  ;;  %v677_v44 = vadd.f32 %v1979_v46, %v587_v4  ;;  %v498_v8 = vadd.f32 %v1983_v48, %v403_v39 }
 0x10d   : > { %v745_v11 = vpop.f32.mrf.mxu1 }
 0x10e   : > { %v1034_v14 = vadd.f32 %v1010_v2, %v944_v9  ;;  %v765_v33 = vadd.f32 %v745_v11, %v675_v28  ;;  %v588_v31 = vadd.f32 %v1985_v49, %v498_v8  ;;  %v500_v28 = vadd.f32 %v1997_v58, %v409_v47 }
 0x110   : > { %v1045_v18 = vadd.f32 %v2008_v10, %v1034_v14  ;;  %v678_v48 = vadd.f32 %v1987_v50, %v588_v31 }
 0x111   : > { %v833_v20 = vpop.f32.mrf.mxu2 }
 0x112   : > { %v855_v19 = vadd.f32 %v833_v20, %v764_v16  ;;  %v1053_v23 = vmax.f32 %v1045_v18, 0.0  ;;  %v499_v20 = vadd.f32 %v1991_v52, %v406_v43 }
 0x113   : > { %v923_v25 = vpop.f32.mrf.mxu3 }
 0x114   : > { %1062 = vst.msk [vmem:[%s2014_s19] sm:$0xff] %vm1061_vm2, %v1053_v23  ;;  %v945_v35 = vadd.f32 %v923_v25, %v855_v19  ;;  %v1013_v26 = vpop.f32.mrf.mxu0  ;;  %v589_v24 = vadd.f32 %v1993_v54, %v499_v20 }
 0x115   : > { %v748_v27 = vpop.f32.mrf.mxu1 }
 0x116   : > { %v1035_v32 = vadd.f32 %v1013_v26, %v945_v35  ;;  %v766_v1 = vadd.f32 %v748_v27, %v676_v38  ;;  %v679_v52 = vadd.f32 %v1995_v55, %v589_v24 }
 0x118   : > { %v1046_v36 = vadd.f32 %v2008_v10, %v1035_v32 }
 0x119   : > { %v836_v37 = vpop.f32.mrf.mxu2 }
 0x11a   : > { %v856_v56 = vadd.f32 %v836_v37, %v765_v33  ;;  %v1054_v17 = vmax.f32 %v1046_v36, 0.0  ;;  %v590_v36 = vadd.f32 %v1999_v61, %v500_v28 }
 0x11b   : > { %v926_v57 = vpop.f32.mrf.mxu3 }
 0x11c   : > { %1063 = vst.msk [vmem:[%s2014_s19 + $0x8] sm:$0xff] %vm1061_vm2, %v1054_v17  ;;  %v946_v59 = vadd.f32 %v926_v57, %v856_v56  ;;  %v1016_v60 = vpop.f32.mrf.mxu0  ;;  %v680_v58 = vadd.f32 %v2001_v62, %v590_v36 }
 0x11d   : > { %v751_v0 = vpop.f32.mrf.mxu1 }
 0x11e   : > { %v1036_v63 = vadd.f32 %v1016_v60, %v946_v59  ;;  %v767_v2 = vadd.f32 %v751_v0, %v677_v44 }
 0x120   : > { %v1047_v41 = vadd.f32 %v2008_v10, %v1036_v63 }
 0x121   : > { %v839_v3 = vpop.f32.mrf.mxu2 }
 0x122   : > { %v857_v5 = vadd.f32 %v839_v3, %v766_v1  ;;  %v1055_v13 = vmax.f32 %v1047_v41, 0.0 }
 0x123   : > { %v929_v6 = vpop.f32.mrf.mxu3 }
 0x124   : > { %1064 = vst.msk [vmem:[%s2014_s19 + $0x10] sm:$0xff] %vm1061_vm2, %v1055_v13  ;;  %v947_v42 = vadd.f32 %v929_v6, %v857_v5  ;;  %v1019_v7 = vpop.f32.mrf.mxu0 }
 0x125   : > { %v754_v15 = vpop.f32.mrf.mxu1 }
 0x126   : > { %v1037_v9 = vadd.f32 %v1019_v7, %v947_v42  ;;  %v768_v19 = vadd.f32 %v754_v15, %v678_v48 }
 0x128   : > { %v1048_v11 = vadd.f32 %v2008_v10, %v1037_v9 }
 0x129   : > { %v842_v45 = vpop.f32.mrf.mxu2 }
 0x12a   : > { %v858_v14 = vadd.f32 %v842_v45, %v767_v2  ;;  %v1056_v21 = vmax.f32 %v1048_v11, 0.0 }
 0x12b   : > { %v932_v16 = vpop.f32.mrf.mxu3 }
 0x12c   : > { %1065 = vst.msk [vmem:[%s2014_s19 + $0x18] sm:$0xff] %vm1061_vm2, %v1056_v21  ;;  %v948_v46 = vadd.f32 %v932_v16, %v858_v14  ;;  %v1022_v18 = vpop.f32.mrf.mxu0 }
 0x12d   : > { %v757_v30 = vpop.f32.mrf.mxu1 }
 0x12e   : > { %v1038_v12 = vadd.f32 %v1022_v18, %v948_v46  ;;  %v769_v32 = vadd.f32 %v757_v30, %v679_v52 }
 0x130   : > { %v1049_v23 = vadd.f32 %v2008_v10, %v1038_v12 }
 0x131   : > { %v845_v49 = vpop.f32.mrf.mxu2 }
 0x132   : > { %v859_v25 = vadd.f32 %v845_v49, %v768_v19  ;;  %v1057_v35 = vmax.f32 %v1049_v23, 0.0 }
 0x133   : > { %v935_v26 = vpop.f32.mrf.mxu3 }
 0x134   : > { %1066 = vst.msk [vmem:[%s2014_s19 + $0x20] sm:$0xff] %vm1061_vm2, %v1057_v35  ;;  %v949_v50 = vadd.f32 %v935_v26, %v859_v25  ;;  %v1025_v27 = vpop.f32.mrf.mxu0 }
 0x135   : > { %v760_v51 = vpop.f32.mrf.mxu1 }
 0x136   : > { %v1039_v29 = vadd.f32 %v1025_v27, %v949_v50  ;;  %v770_v34 = vadd.f32 %v760_v51, %v680_v58 }
 0x138   : > { %v1050_v54 = vadd.f32 %v2008_v10, %v1039_v29 }
 0x139   : > { %v848_v33 = vpop.f32.mrf.mxu2 }
 0x13a   : > { %v860_v37 = vadd.f32 %v848_v33, %v769_v32  ;;  %v1058_v53 = vmax.f32 %v1050_v54, 0.0 }
 0x13b   : > { %v938_v22 = vpop.f32.mrf.mxu3 }
 0x13c   : > { %1067 = vst.msk [vmem:[%s2014_s19 + $0x28] sm:$0xff] %vm1061_vm2, %v1058_v53  ;;  %v950_v56 = vadd.f32 %v938_v22, %v860_v37  ;;  %v1028_v55 = vpop.f32.mrf.mxu0 }
 0x13e   : > { %v1040_v17 = vadd.f32 %v1028_v55, %v950_v56 }
 0x140   : > { %v1051_v57 = vadd.f32 %v2008_v10, %v1040_v17 }
 0x141   : > { %v851_v59 = vpop.f32.mrf.mxu2 }
 0x142   : > { %v861_v61 = vadd.f32 %v851_v59, %v770_v34  ;;  %v1059_v60 = vmax.f32 %v1051_v57, 0.0 }
 0x143   : > { %v941_v38 = vpop.f32.mrf.mxu3 }
 0x144   : > { %1068 = vst.msk [vmem:[%s2014_s19 + $0x30] sm:$0xff] %vm1061_vm2, %v1059_v60  ;;  %v951_v40 = vadd.f32 %v941_v38, %v861_v61  ;;  %v1031_v62 = vpop.f32.mrf.mxu0 }
 0x146   : > { %v1041_v63 = vadd.f32 %v1031_v62, %v951_v40 }
 0x148   : > { %v1052_v0 = vadd.f32 %v2008_v10, %v1041_v63 }
 0x14a   : > { %v1060_v1 = vmax.f32 %v1052_v0, 0.0 }
 0x14c   : > { %1069 = vst.msk [vmem:[%s2014_s19 + $0x38] sm:$0xff] %vm1061_vm2, %v1060_v1 }
 0x14d   : > { %1392 = shalt.err (!%p1389_p3)
}
 0x14e   : > { %s1430_s11 = smov 128   ;;  %s1431_s9 = smov 8  }
 0x14f   : > { %1322 = dma.vmem_to_hbm [thread:$0]  (%p1490_p5), %s1084_s27, 1024, %s1086_s28, %s1071_s16, %s1430_s11, %s1430_s11, %s1431_s9  }
 0x150 PF: > { %p1328_p4 = scmp.ge.s32.totalorder %s1427_s15, 2  ;;  %s1100_s10 = sand.u32 1, %s1415_s12  }
 0x151   : > { %s1101_s17 = scalar_lea.sflag [#allocation4], %s1100_s10 }
 0x152   : > { %p1325_p7 = pnand %p1328_p4, %p1494_p6 }
 0x154   : > { %p1326_p8 = pneg %p1325_p7 }
 0x156   : > { %1410 = dma.done.wait (%p1326_p8), %s1101_s17, 1024  }
 0x157   : > { %1412 = vsyncadd (%p1326_p8), %s1101_s17, 4294966272  ;;  %p13_p9 = scmp.ge.s32.totalorder %s1477_s18, 4   ;;  %s2100_s12 = smov %s1419_s13 }
 0x158   : > { %s2101_s13 = smov %s1423_s14  ;;  %s2102_s14 = smov %s1488_s21 }
 0x159   : > { %s2103_s15 = smov %s1477_s18  ;;  %15 = sbr.rel (!%p13_p9) target bundleno = 3 (0x3), region = 78 }
 0x15e   :  { %1107 = vsyncpa [#allocation4], 1 }
 0x15f   :  { %1109 = vsyncpa [#allocation4 + $0x1], 1 }

</bundles_post_ra>
